<compile_context>
chip_gen: v5e
topology: v5e:2x2
jax: 0.10.0
libtpu: 0.0.40
codegen_flags: <defaults>
</compile_context>

<pallas_src>
import functools

import jax
import jax.numpy as jnp
from jax.experimental import pallas as pl
from jax.experimental.pallas import tpu as pltpu

INPUT_SIZE = 27
OUTPUT_SIZE = 1

_LANE = 128
_MAX_BLOCK_B = 8192                  # review cap for the (block_b, 27) layout
_VMEM_BUDGET_BYTES = 24 * 1024 * 1024  # sizing budget for tiles + temporaries
_VMEM_LIMIT_BYTES = 40 * 1024 * 1024   # safe on v5e/v6e (128 MiB) and v7x (64 MiB)


def _round_up(x, m):
    return ((x + m - 1) // m) * m


def _pick_block_b(B, H):
    """Batch tile size: big (amortize ~0.35 us/step), VMEM-safe, >=2 blocks."""
    if B <= _LANE:
        return B  # single exact-size block: no padding, no raggedness
    # Per-row VMEM bytes: double-buffered x tile (27 lanes pad to 128),
    # double-buffered (tb, 1) output tile (1 lane pads to 128), and ~2 f32
    # (tb, H) hidden-activation temporaries (H lane-padded to 128).
    h_pad = _round_up(H, _LANE)
    per_row = 2 * 4 * _LANE + 2 * 4 * _LANE + 2 * 4 * h_pad
    cap = (_VMEM_BUDGET_BYTES // per_row) // _LANE * _LANE
    cap = max(_LANE, min(_MAX_BLOCK_B, cap))
    # Keep >= 2 grid steps so both v7x TensorCores get work ("parallel" axis).
    return min(cap, _round_up(pl.cdiv(B, 2), _LANE))


def _mlp_kernel(x_ref, w1t_ref, b1_ref, w2_ref, b2_ref, o_ref):
    # x_ref:   (tb, 27)  VMEM  -- contiguous row block straight from HBM
    # w1t_ref: (27, H)   VMEM  -- fc1 weight, pre-transposed once outside
    # b1_ref:  (1, H)    VMEM
    # w2_ref:  (1, H)    VMEM  -- fc2 weight row (PyTorch layout)
    # b2_ref:  (1,)      SMEM  -- fc2 bias scalar
    # o_ref:   (tb, 1)   VMEM
    # Layer 1 on the MXU (batch on sublanes, f32 accumulation).
    h = jnp.dot(x_ref[...], w1t_ref[...], preferred_element_type=jnp.float32)
    h = jnp.maximum(h + b1_ref[...], 0.0)                    # bias + ReLU (VPU)
    # Layer 2 (single output unit): VPU broadcast-multiply + lane reduction
    # (XLU) instead of an N=1 MXU matmul.
    z = jnp.sum(h * w2_ref[...], axis=1, keepdims=True) + b2_ref[0]
    # Exact, numerically stable sigmoid: exp argument is always <= 0.
    ez = jnp.exp(-jnp.abs(z))
    o_ref[...] = jnp.where(z >= 0.0, 1.0 / (1.0 + ez), ez / (1.0 + ez))


@functools.partial(jax.jit, static_argnames=("block_b",))
def tictactoe_mlp_forward(x, w1, b1, w2, b2, *, block_b=None):
    """x: (B, 27) f32; w1: (H, 27); b1: (H,); w2: (1, H); b2: (1,) -> (B, 1)."""
    if isinstance(x, (list, tuple)):       # mirrors forward()'s `if type(x) == list`
        x = x[0]
    B, in_dim = x.shape
    H = w1.shape[0]

    if block_b is None:
        block_b = _pick_block_b(B, H)
    num_blocks = pl.cdiv(B, block_b)       # ragged last block; no batch padding

    # Layout plumbing on the tiny parameters only; x is consumed as-is.
    w1t = w1.T                             # (27, H)
    b1r = b1.reshape(1, H)                 # (1, H)
    w2r = w2.reshape(1, H)                 # (1, H)
    b2s = b2.reshape(-1)                   # (1,) scalar -> SMEM

    cost = pl.CostEstimate(
        flops=2 * B * in_dim * H + 4 * B * H + 5 * B,
        transcendentals=B,
        bytes_accessed=4 * (B * in_dim + in_dim * H + 2 * H + 1 + B),
    )

    return pl.pallas_call(
        _mlp_kernel,
        out_shape=jax.ShapeDtypeStruct((B, OUTPUT_SIZE), jnp.float32),
        grid=(num_blocks,),
        in_specs=[
            # x: contiguous (block_b, 27) row blocks; only pass over x in HBM.
            pl.BlockSpec((block_b, in_dim), lambda i: (i, 0)),
            # Parameters: full arrays, constant index maps -> resident.
            pl.BlockSpec((in_dim, H), lambda i: (0, 0)),
            pl.BlockSpec((1, H), lambda i: (0, 0)),
            pl.BlockSpec((1, H), lambda i: (0, 0)),
            pl.BlockSpec(memory_space=pltpu.MemorySpace.SMEM),
        ],
        out_specs=pl.BlockSpec((block_b, OUTPUT_SIZE), lambda i: (i, 0)),
        compiler_params=pltpu.CompilerParams(
            dimension_semantics=("parallel",),
            vmem_limit_bytes=_VMEM_LIMIT_BYTES,
        ),
        cost_estimate=cost,
    )(x, w1t, b1r, w2r, b2s)


def _reference_forward(x, w1, b1, w2, b2):
    hi = jax.lax.Precision.HIGHEST
    h = jnp.maximum(jnp.dot(x, w1.T, precision=hi) + b1, 0.0)
    z = jnp.dot(h, w2.T, precision=hi) + b2
    return jax.nn.sigmoid(z)


if __name__ == "__main__":
    key = jax.random.PRNGKey(0)
    H = 32  # hidden_layer_size

    k_w1, k_b1, k_w2, k_b2, k_board = jax.random.split(key, 5)

    # nn.Linear-style U(-1/sqrt(fan_in), 1/sqrt(fan_in)) init.
    bound1 = 1.0 / jnp.sqrt(float(INPUT_SIZE))
    bound2 = 1.0 / jnp.sqrt(float(H))
    w1 = jax.random.uniform(k_w1, (H, INPUT_SIZE), jnp.float32, -bound1, bound1)
    b1 = jax.random.uniform(k_b1, (H,), jnp.float32, -bound1, bound1)
    w2 = jax.random.uniform(k_w2, (OUTPUT_SIZE, H), jnp.float32, -bound2, bound2)
    b2 = jax.random.uniform(k_b2, (OUTPUT_SIZE,), jnp.float32, -bound2, bound2)
    # Snap parameters to the bf16 grid (still stored as f32): with 0/1 board
    # features this makes the matmul exact regardless of the MXU f32 pass
    # configuration, so the kernel/reference check stays tight.
    w1, b1, w2, b2 = [v.astype(jnp.bfloat16).astype(jnp.float32)
                      for v in (w1, b1, w2, b2)]

    def make_boards(k, batch):
        # Tic-tac-toe boards: 9 cells in {empty, X, O} -> 27-dim one-hot.
        cells = jax.random.randint(k, (batch, 9), 0, 3)
        return jax.nn.one_hot(cells, 3, dtype=jnp.float32).reshape(batch, 27)

    # 1) Small batch -> single exact-size block (no padding anywhere).
    x_small = make_boards(k_board, 8)
    out_small = jax.block_until_ready(tictactoe_mlp_forward(x_small, w1, b1, w2, b2))
    ref_small = _reference_forward(x_small, w1, b1, w2, b2)
    assert out_small.shape == (8, OUTPUT_SIZE), out_small.shape
    assert jnp.allclose(out_small, ref_small, atol=1e-5, rtol=1e-5), "mismatch (single block)"

    # 2) Multi-block grid with a ragged last block (40 rows, 16-row blocks).
    x_multi = make_boards(jax.random.fold_in(k_board, 1), 40)
    out_multi = jax.block_until_ready(
        tictactoe_mlp_forward(x_multi, w1, b1, w2, b2, block_b=16))
    ref_multi = _reference_forward(x_multi, w1, b1, w2, b2)
    assert out_multi.shape == (40, OUTPUT_SIZE), out_multi.shape
    assert jnp.allclose(out_multi, ref_multi, atol=1e-5, rtol=1e-5), "mismatch (ragged grid)"

    print("KERNEL_OK")
</pallas_src>

<mosaic_0001>
module attributes {stable_mosaic.version = 11 : i64} {
  func.func @_mlp_kernel(%arg0: i32, %arg1: memref<8x27xf32, #tpu.memory_space<vmem>>, %arg2: memref<27x32xf32, #tpu.memory_space<vmem>>, %arg3: memref<1x32xf32, #tpu.memory_space<vmem>>, %arg4: memref<1x32xf32, #tpu.memory_space<vmem>>, %arg5: memref<1xf32, #tpu.memory_space<smem>>, %arg6: memref<8x1xf32, #tpu.memory_space<vmem>>) attributes {dimension_semantics = [#tpu.dimension_semantics<parallel>], iteration_bounds = array<i64: 1>, scalar_prefetch = 0 : i64, scratch_operands = 0 : i64, tpu.core_type = #tpu.core_type<tc>, window_params = [{transform_indices = @transform_0, window_bounds = array<i64: 8, 27>}, {pipeline_mode = #tpu.pipeline_mode<synchronous>, transform_indices = @transform_1, window_bounds = array<i64: 27, 32>}, {pipeline_mode = #tpu.pipeline_mode<synchronous>, transform_indices = @transform_2, window_bounds = array<i64: 1, 32>}, {pipeline_mode = #tpu.pipeline_mode<synchronous>, transform_indices = @transform_3, window_bounds = array<i64: 1, 32>}, {transform_indices = @transform_4, window_bounds = array<i64: 1>}, {transform_indices = @transform_5, window_bounds = array<i64: 8, 1>}]} {
    %c0 = arith.constant 0 : index
    %c0_0 = arith.constant 0 : index
    %0 = vector.load %arg1[%c0, %c0_0] : memref<8x27xf32, #tpu.memory_space<vmem>>, vector<8x27xf32>
    %c0_1 = arith.constant 0 : index
    %c0_2 = arith.constant 0 : index
    %1 = vector.load %arg2[%c0_1, %c0_2] : memref<27x32xf32, #tpu.memory_space<vmem>>, vector<27x32xf32>
    %cst = arith.constant dense<0.000000e+00> : vector<8x32xf32>
    %2 = tpu.matmul %0, %1, %cst {dimension_numbers = #tpu.dot_dimension_numbers<[1], [0], [0], [1], [0, 0, 1, 1], [], []>} : vector<8x27xf32>, vector<27x32xf32>, vector<8x32xf32> -> vector<8x32xf32>
    %c0_3 = arith.constant 0 : index
    %c0_4 = arith.constant 0 : index
    %3 = vector.load %arg3[%c0_3, %c0_4] : memref<1x32xf32, #tpu.memory_space<vmem>>, vector<1x32xf32>
    %4 = vector.broadcast %3 : vector<1x32xf32> to vector<8x32xf32>
    %5 = arith.addf %2, %4 : vector<8x32xf32>
    %cst_5 = arith.constant 0.000000e+00 : f32
    %6 = vector.broadcast %cst_5 : f32 to vector<8x32xf32>
    %7 = arith.maximumf %5, %6 : vector<8x32xf32>
    %c0_6 = arith.constant 0 : index
    %c0_7 = arith.constant 0 : index
    %8 = vector.load %arg4[%c0_6, %c0_7] : memref<1x32xf32, #tpu.memory_space<vmem>>, vector<1x32xf32>
    %9 = vector.broadcast %8 : vector<1x32xf32> to vector<8x32xf32>
    %10 = arith.mulf %7, %9 : vector<8x32xf32>
    %cst_8 = arith.constant dense<0.000000e+00> : vector<8xf32>
    %11 = vector.multi_reduction <add>, %10, %cst_8 [1] : vector<8x32xf32> to vector<8xf32>
    %12 = vector.shape_cast %11 : vector<8xf32> to vector<8x1xf32>
    %c0_9 = arith.constant 0 : index
    %13 = memref.load %arg5[%c0_9] : memref<1xf32, #tpu.memory_space<smem>>
    %14 = vector.broadcast %13 : f32 to vector<8x1xf32>
    %15 = arith.addf %12, %14 : vector<8x1xf32>
    %16 = math.absf %15 : vector<8x1xf32>
    %cst_10 = arith.constant 0.000000e+00 : f32
    %17 = vector.broadcast %cst_10 : f32 to vector<8x1xf32>
    %18 = arith.subf %17, %16 : vector<8x1xf32>
    %19 = math.exp %18 : vector<8x1xf32>
    %cst_11 = arith.constant 0.000000e+00 : f32
    %20 = vector.broadcast %cst_11 : f32 to vector<8x1xf32>
    %21 = arith.cmpf oge, %15, %20 : vector<8x1xf32>
    %cst_12 = arith.constant 1.000000e+00 : f32
    %22 = vector.broadcast %cst_12 : f32 to vector<8x1xf32>
    %23 = arith.addf %22, %19 : vector<8x1xf32>
    %cst_13 = arith.constant 1.000000e+00 : f32
    %24 = vector.broadcast %cst_13 : f32 to vector<8x1xf32>
    %25 = arith.divf %24, %23 : vector<8x1xf32>
    %cst_14 = arith.constant 1.000000e+00 : f32
    %26 = vector.broadcast %cst_14 : f32 to vector<8x1xf32>
    %27 = arith.addf %26, %19 : vector<8x1xf32>
    %28 = arith.divf %19, %27 : vector<8x1xf32>
    %29 = arith.select %21, %25, %28 : vector<8x1xi1>, vector<8x1xf32>
    %c0_15 = arith.constant 0 : index
    %c0_16 = arith.constant 0 : index
    %30 = vector.load %arg6[%c0_15, %c0_16] : memref<8x1xf32, #tpu.memory_space<vmem>>, vector<8x1xf32>
    tpu.vector_store %arg6[%c0_15, %c0_16], %29 {strides = array<i32>} : memref<8x1xf32, #tpu.memory_space<vmem>>, vector<8x1xf32>,
    return
  }
  func.func @transform_0(%arg0: i32) -> (i32, i32) {
    %c0_i32 = arith.constant 0 : i32
    %c0_i32_0 = arith.constant 0 : i32
    return %arg0, %c0_i32 : i32, i32
  }
  func.func @transform_1(%arg0: i32) -> (i32, i32) {
    %c0_i32 = arith.constant 0 : i32
    %c0_i32_0 = arith.constant 0 : i32
    %c0_i32_1 = arith.constant 0 : i32
    return %c0_i32, %c0_i32_0 : i32, i32
  }
  func.func @transform_2(%arg0: i32) -> (i32, i32) {
    %c0_i32 = arith.constant 0 : i32
    %c0_i32_0 = arith.constant 0 : i32
    %c0_i32_1 = arith.constant 0 : i32
    return %c0_i32, %c0_i32_0 : i32, i32
  }
  func.func @transform_3(%arg0: i32) -> (i32, i32) {
    %c0_i32 = arith.constant 0 : i32
    %c0_i32_0 = arith.constant 0 : i32
    %c0_i32_1 = arith.constant 0 : i32
    return %c0_i32, %c0_i32_0 : i32, i32
  }
  func.func @transform_4(%arg0: i32) -> i32 {
    %c0_i32 = arith.constant 0 : i32
    %c0_i32_0 = arith.constant 0 : i32
    return %c0_i32 : i32
  }
  func.func @transform_5(%arg0: i32) -> (i32, i32) {
    %c0_i32 = arith.constant 0 : i32
    %c0_i32_0 = arith.constant 0 : i32
    return %arg0, %c0_i32 : i32, i32
  }
}

</mosaic_0001>

<bundles_post_ra>
// kernel: tictactoe_mlp_forward.1
= control target key start
LH: loop header
LB: loop body
LE: loop exit
PB: predicated region body
PF: predicated region fallthrough
CT: control target
= control target key end

     0   :  { %vm34_vm0 = vcmask 1042432   ;;  %vm30_vm1 = vcmask 220160   ;;  %vm64_vm2 = vcmask 261120   ;;  %vm94_vm7 = vcmask 7168   ;;  %s165_s1 = inlined_call_operand.vmem [shape: f32[27,32], index: 1, kind: input, shape index: {}]   ;;  %s166_s2 = inlined_call_operand.vmem [shape: f32[1,32], index: 2, kind: input, shape index: {}]   ;;  %s167_s0 = inlined_call_operand.vmem [shape: f32[8,27], index: 0, kind: input, shape index: {}]   ;;  %s168_s3 = inlined_call_operand.vmem [shape: f32[1,32], index: 3, kind: input, shape index: {}]   ;;  %s169_s4 = inlined_call_operand.<no memory space> [shape: f32[1], index: 4, kind: input, shape index: {}]   ;;  %s170_s5 = inlined_call_operand.vmem [shape: f32[8,1], index: 5, kind: output, shape index: {}]  }
   0x1   :  { %v25_v0 = vld [vmem:[%s165_s1 + $0x18] sm:$0x7]  ;;  %v24_v1 = vld [vmem:[%s165_s1 + $0x10] sm:$0xff]  ;;  %v23_v2 = vld [vmem:[%s165_s1 + $0x8] sm:$0xff]  ;;  %v69_v12 = vstv %s169_s4 }
   0x2   :  { %100 = vmatpush.msk.msra.mxu0 %vm34_vm0, %v25_v0  ;;  %v22_v3 = vld [vmem:[%s165_s1] sm:$0xff] }
   0x3   :  { %v21_v4 = vld [vmem:[%s167_s0] sm:$0xff] }
   0x4   :  { %51 = vmatpush.msra.mxu0 %v24_v1  ;;  %v102_v5 = vld [vmem:[%s166_s2] ss:$0 sm:$0xff] }
   0x5   :  { %v103_v8 = vld [vmem:[%s168_s3] ss:$0 sm:$0xff] }
   0x6   :  { %52 = vmatpush.msra.mxu0 %v23_v2 }
   0x8   :  { %53 = vmatpush.msra.mxu0 %v22_v3 }
   0x9   :  { %101 = vmatmul.msk.f32.vlgmr.msra.gmra.mxu0 %vm30_vm1, %v21_v4 }
  0x86   :  { %v55_v6 = vpop.f32.mrf.mxu0 }
  0x87   :  { %v56_v7 = vadd.f32 %v102_v5, %v55_v6 }
  0x89   :  { %v58_v9 = vmax.f32 %v56_v7, 0.0 }
  0x8b   :  { %v63_v10 = vmul.f32 %v103_v8, %v58_v9 }
  0x8d   :  { %v65_v11 = vsel %vm64_vm2, %v63_v10, 0.0 }
  0x8e   :  { %66 = vadd.xlane.f32.xlu0 %v65_v11 }
 0x101   :  { %v67_v13 = vpop.xlane.xlu0 %66 }
 0x102   :  { %v70_v14 = vadd.f32 %v69_v12, %v67_v13 }
 0x104   :  { %v71_v15 = vand.u32 2147483647, %v70_v14  ;;  %vm75_vm8 = vcmp.ge.f32.partialorder %v70_v14, 0.0 }
 0x106   :  { %v72_v16 = vsub.f32 0.0, %v71_v15 }
 0x108   :  { %v73_v17 = vmul.f32 1.442695, %v72_v16 }
 0x10a   :  { %104 = vpow2.f32 %v73_v17 }
 0x110   :  { %v105_v18 = vpop.eup %104 }
 0x111   :  { %v76_v19 = vadd.f32 1.0, %v105_v18 }
 0x113   :  { %106 = vrcp.f32 %v76_v19  ;;  %v88_v23 = vand.u32 2147483648, %v76_v19  ;;  %v86_v25 = vand.u32 2147483647, %v76_v19  ;;  %vm82_vm4 = vweird.f32 %v76_v19 }
 0x115   :  { %v89_v27 = vor.u32 1.1754944e-38, %v88_v23  ;;  %vm87_vm6 = vcmp.eq.f32.partialorder %v86_v25, 8.507059e+37 }
 0x119   :  { %v107_v20 = vpop.eup %106 }
 0x11a   :  { %v78_v21 = vmul.f32 %v107_v20, %v76_v19  ;;  %vm83_vm3 = vweird.f32 %v107_v20 }
 0x11b   :  { %vm84_vm5 = vmor %vm82_vm4, %vm83_vm3 }
 0x11c   :  { %v79_v22 = vsub.f32 1.0, %v78_v21 }
 0x11e   :  { %v80_v24 = vmul.f32 %v107_v20, %v79_v22 }
 0x120   :  { %v81_v26 = vadd.f32 %v107_v20, %v80_v24 }
 0x122   :  { %v85_v28 = vsel %vm84_vm5, %v107_v20, %v81_v26 }
 0x123   :  { %v90_v29 = vsel %vm87_vm6, %v89_v27, %v85_v28 }
 0x124   :  { %v92_v30 = vmul.f32 %v105_v18, %v90_v29 }
 0x126   :  { %v93_v31 = vsel %vm75_vm8, %v90_v29, %v92_v30 }
 0x127   :  { %95 = vst.msk [vmem:[%s170_s5] sm:$0xff] %vm94_vm7, %v93_v31 }

</bundles_post_ra>
